<compile_context>
chip_gen: v7x
topology: tpu7x:2x2x1
jax: 0.10.0
libtpu: 0.0.40
codegen_flags: <defaults>
</compile_context>

<pallas_src>
import warnings

import jax
import jax.numpy as jnp
from jax.experimental import pallas as pl
from jax.experimental.pallas import tpu as pltpu

_MIB = 1 << 20


# ---------------------------------------------------------------------------
# Kernel
# ---------------------------------------------------------------------------
def _bias_kernel(b_ref, x_ref, o_ref):
    # b_ref: (1,) scalar bias in SMEM.  x_ref / o_ref: VMEM tiles.
    o_ref[...] = x_ref[...] + b_ref[0]


# ---------------------------------------------------------------------------
# Tiling helpers
# ---------------------------------------------------------------------------
def _sublane_pack(dtype):
    itemsize = jnp.dtype(dtype).itemsize
    return {4: 8, 2: 16, 1: 32}.get(itemsize, 8)


def _target_tile_bytes():
    """Generation-aware per-tile byte target (bigger where HBM is faster)."""
    try:
        kind = jax.devices()[0].device_kind.lower()
    except Exception:
        return 2 * _MIB
    if "v5" in kind:   # 16 MiB scoped-VMEM default -> stay modest
        return 2 * _MIB
    if "v6" in kind:   # 128 MiB VMEM, 32 MiB scoped default
        return 4 * _MIB
    if "v7" in kind:   # ~3.2 TB/s HBM: amortize the ~0.35 us/step overhead
        return 6 * _MIB
    return 2 * _MIB


def _vmem_limit(block_vmem_bytes):
    # 2x double-buffered input + output tiles (the HBM alias does NOT dedupe
    # VMEM buffers) plus headroom for Mosaic internal scratch.
    return int(4 * block_vmem_bytes + 8 * _MIB)


def _pick_lane(n, pack):
    # Prefer a wide lane-dense last dim whose row count is sublane-aligned.
    for lane in (2048, 1024, 512, 256, 128):
        if n % lane == 0 and (n // lane) % pack == 0:
            return lane
    for lane in (2048, 1024, 512, 256, 128):
        if n % lane == 0:
            return lane
    return None


def _block_rows_for(rows, lane, itemsize, pack, tile_bytes):
    br = (tile_bytes // (lane * itemsize)) // pack * pack
    br = max(pack, br)
    if rows >= 2 * pack:
        # Keep the grid >= 2 steps so the "parallel" axis can shard rows across
        # both v7x TensorCores (measured no-op on single-TC v5e/v6e).
        half = max(pack, (rows // 2) // pack * pack)
        br = min(br, half)
    if br >= rows or rows < pack:
        return rows          # full-extent block (always legal)
    return br                # multiple of `pack` -> satisfies (8,128) rule


# ---------------------------------------------------------------------------
# pallas_call builders
# ---------------------------------------------------------------------------
def _bias_2d(x2d, bias, block_rows, lane):
    rows = x2d.shape[0]
    itemsize = jnp.dtype(x2d.dtype).itemsize
    pack = _sublane_pack(x2d.dtype)
    padded_rows = -(-block_rows // pack) * pack
    block_bytes = padded_rows * lane * itemsize
    n = rows * lane
    return pl.pallas_call(
        _bias_kernel,
        out_shape=jax.ShapeDtypeStruct((rows, lane), x2d.dtype),
        grid=(pl.cdiv(rows, block_rows),),
        in_specs=[
            pl.BlockSpec(memory_space=pltpu.MemorySpace.SMEM),       # scalar bias
            pl.BlockSpec((block_rows, lane), lambda i: (i, 0)),      # x tile
        ],
        out_specs=pl.BlockSpec((block_rows, lane), lambda i: (i, 0)),
        input_output_aliases={1: 0},   # output aliases x (elementwise, in-place safe)
        cost_estimate=pl.CostEstimate(
            flops=n, transcendentals=0,
            bytes_accessed=2 * n * itemsize + int(bias.dtype.itemsize)),
        compiler_params=pltpu.CompilerParams(
            dimension_semantics=("parallel",),
            vmem_limit_bytes=_vmem_limit(block_bytes)),
    )(bias, x2d)


def _bias_ragged(x_flat, bias, tile_cols):
    # x_flat: (1, n) no-copy view; block (1, tile_cols); the partial last block
    # is handled by Pallas' bounds-masked DMA -> no pad copy, no slice copy.
    n = x_flat.shape[1]
    itemsize = jnp.dtype(x_flat.dtype).itemsize
    pack = _sublane_pack(x_flat.dtype)
    block_bytes = pack * tile_cols * itemsize   # sublane-padded VMEM footprint
    return pl.pallas_call(
        _bias_kernel,
        out_shape=jax.ShapeDtypeStruct((1, n), x_flat.dtype),
        grid=(pl.cdiv(n, tile_cols),),
        in_specs=[
            pl.BlockSpec(memory_space=pltpu.MemorySpace.SMEM),
            pl.BlockSpec((1, tile_cols), lambda i: (0, i)),
        ],
        out_specs=pl.BlockSpec((1, tile_cols), lambda i: (0, i)),
        input_output_aliases={1: 0},
        cost_estimate=pl.CostEstimate(
            flops=n, transcendentals=0,
            bytes_accessed=2 * n * itemsize + int(bias.dtype.itemsize)),
        compiler_params=pltpu.CompilerParams(
            dimension_semantics=("parallel",),
            vmem_limit_bytes=_vmem_limit(block_bytes)),
    )(bias, x_flat)


# ---------------------------------------------------------------------------
# Forward
# ---------------------------------------------------------------------------
def _bias_forward(x, bias):
    """x + bias with bias a shape-(1,) learnable scalar."""
    orig_shape = x.shape
    dtype = x.dtype
    n = x.size
    itemsize = jnp.dtype(dtype).itemsize
    pack = _sublane_pack(dtype)
    tile_bytes = _target_tile_bytes()

    # Compute/output in x.dtype so the output can alias x.
    # TODO(synk): PyTorch would promote sub-f32 / integer x to the f32 parameter
    # dtype (different output dtype & rounding); we keep x.dtype here.
    b = bias.astype(dtype)

    lane = _pick_lane(n, pack)
    if lane is not None:
        # Zero-copy path: contiguous reshape into a lane-dense (rows, lane) slab.
        rows = n // lane
        block_rows = _block_rows_for(rows, lane, itemsize, pack, tile_bytes)
        out2d = _bias_2d(x.reshape(rows, lane), b, block_rows, lane)
        return out2d.reshape(orig_shape)

    # Ragged path (n % 128 != 0): no-copy (1, n) view tiled along lanes.
    tile_cols = max(128, (2 * _MIB) // (pack * itemsize) // 128 * 128)
    tile_cols = min(tile_cols, pl.cdiv(n, 128) * 128)
    if n >= 2 * 128:
        half = pl.cdiv((n + 1) // 2, 128) * 128
        tile_cols = min(tile_cols, max(128, half))   # keep >= 2 grid steps
    out2d = _bias_ragged(x.reshape(1, n), b, tile_cols)
    return out2d.reshape(orig_shape)


# Safe default: caller keeps x (XLA may insert a defensive copy for the alias).
bias_forward = jax.jit(_bias_forward)
# True in-place variant: caller donates x so input_output_aliases becomes a
# genuine 1-read / 1-write HBM update.
bias_forward_inplace = jax.jit(_bias_forward, donate_argnums=(0,))


if __name__ == "__main__":
    warnings.filterwarnings("ignore", message="Some donated buffers")

    key = jax.random.PRNGKey(0)

    # Parameter init matching torch.nn.Parameter(torch.zeros(1)).
    bias = jnp.zeros((1,), dtype=jnp.float32)

    # Small NCHW-style input; donated (in-place) call.
    x = jax.random.normal(key, (2, 4, 16, 16), dtype=jnp.float32)
    expected = x + bias                       # reference computed before donation
    out = jax.block_until_ready(bias_forward_inplace(x, bias))
    assert out.shape == expected.shape and out.dtype == expected.dtype
    assert jnp.array_equal(out, expected)

    # Non-zero bias, non-donating call, to make sure the add really happens.
    x2 = jax.random.normal(key, (2, 4, 16, 16), dtype=jnp.float32)
    bias2 = jnp.full((1,), 0.75, dtype=jnp.float32)
    out2 = jax.block_until_ready(bias_forward(x2, bias2))
    assert jnp.array_equal(out2, x2 + bias2)

    # Ragged path (n % 128 != 0): exercises the no-copy (1, n) fallback kernel.
    x3 = jax.random.normal(key, (3, 5, 7), dtype=jnp.float32)
    out3 = jax.block_until_ready(bias_forward(x3, bias2))
    assert jnp.array_equal(out3, x3 + bias2)

    print("KERNEL_OK")
</pallas_src>

<mosaic_0001>
module attributes {stable_mosaic.version = 11 : i64} {
  func.func @_bias_kernel(%arg0: i32, %arg1: memref<1xf32, #tpu.memory_space<smem>>, %arg2: memref<8x256xf32, #tpu.memory_space<vmem>>, %arg3: memref<8x256xf32, #tpu.memory_space<vmem>>) attributes {dimension_semantics = [#tpu.dimension_semantics<parallel>], iteration_bounds = array<i64: 1>, scalar_prefetch = 0 : i64, scratch_operands = 0 : i64, tpu.core_type = #tpu.core_type<tc>, window_params = [{transform_indices = @transform_0, window_bounds = array<i64: 1>}, {transform_indices = @transform_1, window_bounds = array<i64: 8, 256>}, {transform_indices = @transform_2, window_bounds = array<i64: 8, 256>}]} {
    %c0 = arith.constant 0 : index
    %c0_0 = arith.constant 0 : index
    %0 = vector.load %arg2[%c0, %c0_0] : memref<8x256xf32, #tpu.memory_space<vmem>>, vector<8x256xf32>
    %c0_1 = arith.constant 0 : index
    %1 = memref.load %arg1[%c0_1] : memref<1xf32, #tpu.memory_space<smem>>
    %2 = vector.broadcast %1 : f32 to vector<8x256xf32>
    %3 = arith.addf %0, %2 : vector<8x256xf32>
    %c0_2 = arith.constant 0 : index
    %c0_3 = arith.constant 0 : index
    %4 = vector.load %arg3[%c0_2, %c0_3] : memref<8x256xf32, #tpu.memory_space<vmem>>, vector<8x256xf32>
    tpu.vector_store %arg3[%c0_2, %c0_3], %3 {strides = array<i32>} : memref<8x256xf32, #tpu.memory_space<vmem>>, vector<8x256xf32>,
    return
  }
  func.func @transform_0(%arg0: i32) -> i32 {
    %c0_i32 = arith.constant 0 : i32
    %c0_i32_0 = arith.constant 0 : i32
    return %c0_i32 : i32
  }
  func.func @transform_1(%arg0: i32) -> (i32, i32) {
    %c0_i32 = arith.constant 0 : i32
    %c0_i32_0 = arith.constant 0 : i32
    return %arg0, %c0_i32 : i32, i32
  }
  func.func @transform_2(%arg0: i32) -> (i32, i32) {
    %c0_i32 = arith.constant 0 : i32
    %c0_i32_0 = arith.constant 0 : i32
    return %arg0, %c0_i32 : i32, i32
  }
}

</mosaic_0001>

<bundles_post_ra>
// kernel: _bias_forward.1
= control target key start
LH: loop header
LB: loop body
LE: loop exit
PB: predicated region body
PF: predicated region fallthrough
CT: control target
= control target key end

     0   :  { %s54_s0 = inlined_call_operand.<no memory space> [shape: f32[1], index: 0, kind: input, shape index: {}]   ;;  %s55_s1 = inlined_call_operand.vmem [shape: f32[8,256], index: 1, kind: input, shape index: {}, may-alias: {1,2}]   ;;  %s56_s2 = inlined_call_operand.vmem [shape: f32[8,256], index: 2, kind: output, shape index: {}, may-alias: {1,2}]  }
   0x1   :  { %v12_v0 = vld [vmem:[%s55_s1] sm:$0xff]  ;;  %v15_v1 = vstv %s54_s0  ;;  %v13_v2 = vld [vmem:[%s55_s1 + $0x8] sm:$0xff] }
   0x2   :  { %v16_v3 = vadd.f32 %v15_v1, %v12_v0  ;;  %v17_v4 = vadd.f32 %v15_v1, %v13_v2 }
   0x4   :  { %18 = vst [vmem:[%s56_s2] sm:$0xff] %v16_v3  ;;  %19 = vst [vmem:[%s56_s2 + $0x8] sm:$0xff] %v17_v4 }

</bundles_post_ra>
